<compile_context>
chip_gen: v5e
topology: v5e:2x2
jax: 0.10.0
libtpu: 0.0.40
codegen_flags: <defaults>
</compile_context>

<pallas_src>
import functools
import math

import jax
import jax.numpy as jnp
from jax import lax
from jax.experimental import pallas as pl
from jax.experimental.pallas import tpu as pltpu

LOG_2PI = math.log(2.0 * math.pi)
PACK = 128  # lane-dense packed actions slab width (one full vreg lane span)
VL = 8      # narrow f32 output: lane 0 = critic value, lane 1 = log_prob


def _policy_kernel(comb_ref, scat_ref,
                   w1_ref, b1_ref, w2_ref, b2_ref, w3_ref, b3_ref,
                   act_ref, vl_ref, *, state_size, action_size):
    """One batch tile: fused actor+critic trunk + Gaussian sample / log-prob.

    comb_ref lanes: [0:S] states, [S:S+A] noise (all bf16).
    act_ref  lanes: [0:A] actions, rest 0 (bf16, one unmasked lane-dense store).
    vl_ref   lanes: [0] critic value, [1] log_prob, rest 0 (f32).
    """
    S, A = state_size, action_size

    xc = comb_ref[...]                                        # (Bt, S+A) bf16

    # Fused actor|critic MLP: 3 matmuls total (bf16 inputs, f32 accumulation,
    # all elementwise math kept in f32 for v5e's f32-only VPU/EUP).
    z = jnp.dot(xc, w1_ref[...], preferred_element_type=jnp.float32) + b1_ref[...]
    z = jnp.maximum(z, 0.0)
    z = jnp.dot(z.astype(jnp.bfloat16), w2_ref[...],
                preferred_element_type=jnp.float32) + b2_ref[...]
    z = jnp.maximum(z, 0.0)
    # z3 lanes: [0:A] actor pre-tanh, [A] critic value,
    # [A+1] log-prob constant (w3 column A+1 is all zeros by construction,
    # so lane A+1 equals the constant folded into b3), remaining lanes 0.
    z3 = jnp.dot(z.astype(jnp.bfloat16), w3_ref[...],
                 preferred_element_type=jnp.float32) + b3_ref[...]   # (Bt, PACK)

    # std*eps scattered into lanes [0:A]: scat has zero rows for the states part
    # of the merged input and diag(std) rows for the noise part.
    scaled_eps = jnp.dot(xc, scat_ref[...],
                         preferred_element_type=jnp.float32)         # (Bt, PACK)

    # sum_a log N(a; mu, std) = -0.5*sum(eps^2) - sum(log std) - A/2*log(2pi);
    # the constant part lives in b3 lane A+1, only the data part is computed here.
    xf = xc.astype(jnp.float32)
    col = lax.broadcasted_iota(jnp.int32, xf.shape, 1)
    half_sq = -0.5 * jnp.sum(jnp.where(col >= S, xf * xf, 0.0),
                             axis=1, keepdims=True)                  # (Bt, 1)

    lane = lax.broadcasted_iota(jnp.int32, z3.shape, 1)
    # Packed actions slab (bf16): scaled_eps is exactly 0 outside lanes [0:A].
    acts = jnp.where(lane < A, jnp.tanh(z3), 0.0) + scaled_eps
    act_ref[...] = acts.astype(act_ref.dtype)

    # Narrow f32 output keeps critic value / log_prob at full storage precision.
    val = jnp.sum(jnp.where(lane == A, z3, 0.0), axis=1, keepdims=True)
    lp = jnp.sum(jnp.where(lane == A + 1, z3, 0.0), axis=1, keepdims=True) + half_sq
    vlane = lax.broadcasted_iota(jnp.int32, vl_ref.shape, 1)
    vl_ref[...] = jnp.where(vlane == 0, val, jnp.where(vlane == 1, lp, 0.0))


def _round_up(x, m):
    return ((x + m - 1) // m) * m


def actor_critic_policy_forward(states, noise, params, *, b_tile=1024):
    """ActorCriticPolicy.forward with actions=None.

    Returns (actions [B,A], log_prob [B,1], entropy_loss [B], values [B,1]).
    """
    # TODO(synk): the externally-supplied-actions branch (i_dim=2, [B,T,A]) of the
    # PyTorch module is not implemented here.
    B, S = states.shape
    A = noise.shape[1]
    fc1 = params["aw1"].shape[1]
    fc2 = params["aw2"].shape[1]
    SA = S + A
    assert A + 2 <= PACK

    f32, bf16 = jnp.float32, jnp.bfloat16

    # ---- Fuse actor & critic parameters once, outside the kernel ----
    # Layer 1, extended with A zero rows so the merged [states | noise] input needs
    # no in-kernel slicing (noise columns contribute nothing to the trunk).
    w1 = jnp.concatenate([params["aw1"], params["cw1"]], axis=1)               # (S, 2fc1)
    w1e = jnp.concatenate([w1, jnp.zeros((A, 2 * fc1), f32)], axis=0).astype(bf16)
    b1 = jnp.concatenate([params["ab1"], params["cb1"]], axis=1).astype(f32)   # (1, 2fc1)

    # Block-diagonal layer 2.
    # TODO(synk): split layer 2 back into two matmuls sharing z once 2*fc1 / 2*fc2
    # exceed a single MXU tile (128 on v5e, 256 on v6e/v7x); below that the fusion wins.
    z_blk = jnp.zeros((fc1, fc2), f32)
    w2 = jnp.concatenate(
        [jnp.concatenate([params["aw2"], z_blk], axis=1),
         jnp.concatenate([z_blk, params["cw2"]], axis=1)], axis=0).astype(bf16)  # (2fc1, 2fc2)
    b2 = jnp.concatenate([params["ab2"], params["cb2"]], axis=1).astype(f32)     # (1, 2fc2)

    std = params["std"].astype(f32)                           # (1, A); must be > 0
    log_std = jnp.log(std)
    logp_const = -(jnp.sum(log_std) + 0.5 * A * LOG_2PI)      # scalar

    # Lane-padded layer-3 head. Column A+1 of w3 is all zeros by construction so that
    # lane A+1 of z3 is exactly the log-prob constant folded into b3.
    w3 = jnp.zeros((2 * fc2, PACK), f32)
    w3 = w3.at[:fc2, :A].set(params["aw3"])                   # actor head -> lanes [0:A]
    w3 = w3.at[fc2:, A].set(params["cw3"][:, 0])              # critic head -> lane A
    w3 = w3.astype(bf16)
    b3 = jnp.zeros((1, PACK), f32)
    b3 = b3.at[:, :A].set(params["ab3"])
    b3 = b3.at[:, A].set(params["cb3"][0, 0])
    b3 = b3.at[:, A + 1].set(logp_const)                      # log-prob constant lane

    # std*eps scatter for the merged input: zero rows for states, diag(std) for noise.
    scat = jnp.zeros((SA, PACK), f32)
    scat = scat.at[S + jnp.arange(A), jnp.arange(A)].set(std[0])
    scat = scat.astype(bf16)

    # Merged bf16 input: one DMA per grid step, half the read bytes of f32.
    comb = jnp.concatenate([states, noise], axis=1).astype(bf16)       # (B, S+A)

    # ---- Batch tiling: big tiles to amortize per-step overhead, >=2 tiles for v7x ----
    b_tile = min(b_tile, _round_up(B, 8))
    if B > 512:
        b_tile = min(b_tile, _round_up(pl.cdiv(B, 2), 256))
    n_tiles = pl.cdiv(B, b_tile)
    b_pad = n_tiles * b_tile
    if b_pad != B:
        comb = jnp.pad(comb, ((0, b_pad - B), (0, 0)))

    def _resident(arr):  # weights/biases stay in VMEM across the whole grid
        return pl.BlockSpec(arr.shape, lambda i: (0, 0))

    cost = pl.CostEstimate(
        flops=2 * b_pad * (SA * 2 * fc1 + 2 * fc1 * 2 * fc2 + 2 * fc2 * PACK + SA * PACK),
        transcendentals=b_pad * PACK,
        bytes_accessed=(comb.size * 2                    # bf16 merged input
                        + b_pad * PACK * 2               # bf16 actions slab
                        + b_pad * VL * 4                 # f32 value/logp
                        + (w1e.size + w2.size + w3.size + scat.size) * 2
                        + (b1.size + b2.size + b3.size) * 4),
    )

    acts_pack, vl = pl.pallas_call(
        functools.partial(_policy_kernel, state_size=S, action_size=A),
        out_shape=(jax.ShapeDtypeStruct((b_pad, PACK), bf16),
                   jax.ShapeDtypeStruct((b_pad, VL), f32)),
        grid=(n_tiles,),
        in_specs=[
            pl.BlockSpec((b_tile, SA), lambda i: (i, 0)),   # merged states|noise (tiled)
            _resident(scat),
            _resident(w1e), _resident(b1),
            _resident(w2), _resident(b2),
            _resident(w3), _resident(b3),
        ],
        out_specs=(pl.BlockSpec((b_tile, PACK), lambda i: (i, 0)),
                   pl.BlockSpec((b_tile, VL), lambda i: (i, 0))),
        compiler_params=pltpu.CompilerParams(
            dimension_semantics=("parallel",)),   # v7x: shard batch tiles across TCs
        cost_estimate=cost,
    )(comb, scat, w1e, b1, w2, b2, w3, b3)

    actions = acts_pack[:B, :A].astype(f32)
    values = vl[:B, 0:1]
    log_prob = vl[:B, 1:2]

    # Entropy depends only on std (not on the batch): compute once in plain JAX.
    # NOTE: the reference module hard-codes "/ 4" (not "/ action_size").
    # NOTE: std must be strictly positive (same assumption as the reference Normal).
    ent = jnp.sum(0.5 + 0.5 * LOG_2PI + log_std) / 4.0
    entropy_loss = jnp.broadcast_to(ent.astype(f32), (B,))

    return actions, log_prob, entropy_loss, values


def init_params(key, state_size, action_size, fc1_size, fc2_size):
    """Deterministic init mirroring the module's reset_parameters ranges.

    w_init in the reference uses weight.size()[0] == out_features as 'fan_in',
    so the uniform limit is 1/sqrt(out_features) for fc1/fc2.  Weights are
    stored transposed ([in, out]) for the x @ W kernel layout.
    """
    keys = jax.random.split(key, 12)

    def uni(k, shape, lim):
        return jax.random.uniform(k, shape, jnp.float32, minval=-lim, maxval=lim)

    lim1 = 1.0 / math.sqrt(fc1_size)
    lim2 = 1.0 / math.sqrt(fc2_size)

    return {
        # Actor
        "aw1": uni(keys[0], (state_size, fc1_size), lim1),
        "ab1": uni(keys[1], (1, fc1_size), 1.0 / math.sqrt(state_size)),
        "aw2": uni(keys[2], (fc1_size, fc2_size), lim2),
        "ab2": uni(keys[3], (1, fc2_size), 1.0 / math.sqrt(fc1_size)),
        "aw3": uni(keys[4], (fc2_size, action_size), 0.003),
        "ab3": uni(keys[5], (1, action_size), 1.0 / math.sqrt(fc2_size)),
        # Critic
        "cw1": uni(keys[6], (state_size, fc1_size), lim1),
        "cb1": uni(keys[7], (1, fc1_size), 1.0 / math.sqrt(state_size)),
        "cw2": uni(keys[8], (fc1_size, fc2_size), lim2),
        "cb2": uni(keys[9], (1, fc2_size), 1.0 / math.sqrt(fc1_size)),
        "cw3": uni(keys[10], (fc2_size, 1), 0.003),
        "cb3": uni(keys[11], (1, 1), 1.0 / math.sqrt(fc2_size)),
        # self.std = ones(1, action_size)
        "std": jnp.ones((1, action_size), jnp.float32),
    }


def _reference_forward(states, noise, params):
    """Pure-JAX f32 reference of the PyTorch module (actions=None path)."""
    def mlp(x, w1, b1, w2, b2, w3, b3):
        h = jnp.maximum(jnp.dot(x, w1) + b1, 0.0)
        h = jnp.maximum(jnp.dot(h, w2) + b2, 0.0)
        return jnp.dot(h, w3) + b3

    mu = jnp.tanh(mlp(states, params["aw1"], params["ab1"], params["aw2"],
                      params["ab2"], params["aw3"], params["ab3"]))
    v = mlp(states, params["cw1"], params["cb1"], params["cw2"],
            params["cb2"], params["cw3"], params["cb3"])
    std = params["std"]
    acts = mu + std * noise
    logp = jnp.sum(-((acts - mu) ** 2) / (2.0 * std * std) - jnp.log(std)
                   - 0.5 * LOG_2PI, axis=1, keepdims=True)
    ent = jnp.broadcast_to(
        jnp.sum(0.5 + 0.5 * LOG_2PI + jnp.log(std), axis=1) / 4.0,
        (states.shape[0],))
    return acts, logp, ent, v


if __name__ == "__main__":
    # Small shapes consistent with the module's fully-connected forward.
    B, STATE, ACTION, FC1, FC2 = 8, 16, 4, 64, 32

    root = jax.random.PRNGKey(0)
    k_state, k_noise, k_param = jax.random.split(root, 3)

    states = jax.random.normal(k_state, (B, STATE), jnp.float32)
    noise = jax.random.normal(k_noise, (B, ACTION), jnp.float32)  # Normal.sample eps
    params = init_params(k_param, STATE, ACTION, FC1, FC2)

    actions, log_prob, entropy_loss, values = actor_critic_policy_forward(
        states, noise, params)
    jax.block_until_ready((actions, log_prob, entropy_loss, values))

    assert actions.shape == (B, ACTION)
    assert log_prob.shape == (B, 1)
    assert entropy_loss.shape == (B,)
    assert values.shape == (B, 1)

    # Loose tolerance: the kernel runs its matmuls (and the merged input) in bf16.
    ra, rl, re, rv = _reference_forward(states, noise, params)
    assert bool(jnp.allclose(actions, ra, atol=5e-2, rtol=5e-2))
    assert bool(jnp.allclose(log_prob, rl, atol=5e-2, rtol=5e-2))
    assert bool(jnp.allclose(entropy_loss, re, atol=1e-5))
    assert bool(jnp.allclose(values, rv, atol=5e-2, rtol=5e-2))

    print("KERNEL_OK")
</pallas_src>

<mosaic_0001>
module attributes {stable_mosaic.version = 11 : i64} {
  func.func @_policy_kernel(%arg0: i32, %arg1: memref<8x20xbf16, #tpu.memory_space<vmem>>, %arg2: memref<20x128xbf16, #tpu.memory_space<vmem>>, %arg3: memref<20x128xbf16, #tpu.memory_space<vmem>>, %arg4: memref<1x128xf32, #tpu.memory_space<vmem>>, %arg5: memref<128x64xbf16, #tpu.memory_space<vmem>>, %arg6: memref<1x64xf32, #tpu.memory_space<vmem>>, %arg7: memref<64x128xbf16, #tpu.memory_space<vmem>>, %arg8: memref<1x128xf32, #tpu.memory_space<vmem>>, %arg9: memref<8x128xbf16, #tpu.memory_space<vmem>>, %arg10: memref<8x8xf32, #tpu.memory_space<vmem>>) attributes {dimension_semantics = [#tpu.dimension_semantics<parallel>], iteration_bounds = array<i64: 1>, scalar_prefetch = 0 : i64, scratch_operands = 0 : i64, tpu.core_type = #tpu.core_type<tc>, window_params = [{transform_indices = @transform_0, window_bounds = array<i64: 8, 20>}, {pipeline_mode = #tpu.pipeline_mode<synchronous>, transform_indices = @transform_1, window_bounds = array<i64: 20, 128>}, {pipeline_mode = #tpu.pipeline_mode<synchronous>, transform_indices = @transform_2, window_bounds = array<i64: 20, 128>}, {pipeline_mode = #tpu.pipeline_mode<synchronous>, transform_indices = @transform_3, window_bounds = array<i64: 1, 128>}, {pipeline_mode = #tpu.pipeline_mode<synchronous>, transform_indices = @transform_4, window_bounds = array<i64: 128, 64>}, {pipeline_mode = #tpu.pipeline_mode<synchronous>, transform_indices = @transform_5, window_bounds = array<i64: 1, 64>}, {pipeline_mode = #tpu.pipeline_mode<synchronous>, transform_indices = @transform_6, window_bounds = array<i64: 64, 128>}, {pipeline_mode = #tpu.pipeline_mode<synchronous>, transform_indices = @transform_7, window_bounds = array<i64: 1, 128>}, {transform_indices = @transform_8, window_bounds = array<i64: 8, 128>}, {transform_indices = @transform_9, window_bounds = array<i64: 8, 8>}]} {
    %c0 = arith.constant 0 : index
    %c0_0 = arith.constant 0 : index
    %0 = vector.load %arg1[%c0, %c0_0] : memref<8x20xbf16, #tpu.memory_space<vmem>>, vector<8x20xbf16>
    %c0_1 = arith.constant 0 : index
    %c0_2 = arith.constant 0 : index
    %1 = vector.load %arg3[%c0_1, %c0_2] : memref<20x128xbf16, #tpu.memory_space<vmem>>, vector<20x128xbf16>
    %cst = arith.constant dense<0.000000e+00> : vector<8x128xf32>
    %2 = tpu.matmul %0, %1, %cst {dimension_numbers = #tpu.dot_dimension_numbers<[1], [0], [0], [1], [0, 0, 1, 1], [], []>} : vector<8x20xbf16>, vector<20x128xbf16>, vector<8x128xf32> -> vector<8x128xf32>
    %c0_3 = arith.constant 0 : index
    %c0_4 = arith.constant 0 : index
    %3 = vector.load %arg4[%c0_3, %c0_4] : memref<1x128xf32, #tpu.memory_space<vmem>>, vector<1x128xf32>
    %4 = vector.broadcast %3 : vector<1x128xf32> to vector<8x128xf32>
    %5 = arith.addf %2, %4 : vector<8x128xf32>
    %cst_5 = arith.constant 0.000000e+00 : f32
    %6 = vector.broadcast %cst_5 : f32 to vector<8x128xf32>
    %7 = arith.maximumf %5, %6 : vector<8x128xf32>
    %8 = arith.truncf %7 : vector<8x128xf32> to vector<8x128xbf16>
    %c0_6 = arith.constant 0 : index
    %c0_7 = arith.constant 0 : index
    %9 = vector.load %arg5[%c0_6, %c0_7] : memref<128x64xbf16, #tpu.memory_space<vmem>>, vector<128x64xbf16>
    %cst_8 = arith.constant dense<0.000000e+00> : vector<8x64xf32>
    %10 = tpu.matmul %8, %9, %cst_8 {dimension_numbers = #tpu.dot_dimension_numbers<[1], [0], [0], [1], [0, 0, 1, 1], [], []>} : vector<8x128xbf16>, vector<128x64xbf16>, vector<8x64xf32> -> vector<8x64xf32>
    %c0_9 = arith.constant 0 : index
    %c0_10 = arith.constant 0 : index
    %11 = vector.load %arg6[%c0_9, %c0_10] : memref<1x64xf32, #tpu.memory_space<vmem>>, vector<1x64xf32>
    %12 = vector.broadcast %11 : vector<1x64xf32> to vector<8x64xf32>
    %13 = arith.addf %10, %12 : vector<8x64xf32>
    %cst_11 = arith.constant 0.000000e+00 : f32
    %14 = vector.broadcast %cst_11 : f32 to vector<8x64xf32>
    %15 = arith.maximumf %13, %14 : vector<8x64xf32>
    %16 = arith.truncf %15 : vector<8x64xf32> to vector<8x64xbf16>
    %c0_12 = arith.constant 0 : index
    %c0_13 = arith.constant 0 : index
    %17 = vector.load %arg7[%c0_12, %c0_13] : memref<64x128xbf16, #tpu.memory_space<vmem>>, vector<64x128xbf16>
    %cst_14 = arith.constant dense<0.000000e+00> : vector<8x128xf32>
    %18 = tpu.matmul %16, %17, %cst_14 {dimension_numbers = #tpu.dot_dimension_numbers<[1], [0], [0], [1], [0, 0, 1, 1], [], []>} : vector<8x64xbf16>, vector<64x128xbf16>, vector<8x128xf32> -> vector<8x128xf32>
    %c0_15 = arith.constant 0 : index
    %c0_16 = arith.constant 0 : index
    %19 = vector.load %arg8[%c0_15, %c0_16] : memref<1x128xf32, #tpu.memory_space<vmem>>, vector<1x128xf32>
    %20 = vector.broadcast %19 : vector<1x128xf32> to vector<8x128xf32>
    %21 = arith.addf %18, %20 : vector<8x128xf32>
    %c0_17 = arith.constant 0 : index
    %c0_18 = arith.constant 0 : index
    %22 = vector.load %arg2[%c0_17, %c0_18] : memref<20x128xbf16, #tpu.memory_space<vmem>>, vector<20x128xbf16>
    %cst_19 = arith.constant dense<0.000000e+00> : vector<8x128xf32>
    %23 = tpu.matmul %0, %22, %cst_19 {dimension_numbers = #tpu.dot_dimension_numbers<[1], [0], [0], [1], [0, 0, 1, 1], [], []>} : vector<8x20xbf16>, vector<20x128xbf16>, vector<8x128xf32> -> vector<8x128xf32>
    %24 = arith.extf %0 : vector<8x20xbf16> to vector<8x20xf32>
    %25 = tpu.iota {dimensions = array<i32: 1>} : vector<8x20xi32>
    %c16_i32 = arith.constant 16 : i32
    %26 = vector.broadcast %c16_i32 : i32 to vector<8x20xi32>
    %27 = arith.cmpi sge, %25, %26 : vector<8x20xi32>
    %28 = arith.mulf %24, %24 : vector<8x20xf32>
    %cst_20 = arith.constant 0.000000e+00 : f32
    %29 = vector.broadcast %cst_20 : f32 to vector<8x20xf32>
    %30 = arith.select %27, %28, %29 : vector<8x20xi1>, vector<8x20xf32>
    %cst_21 = arith.constant dense<0.000000e+00> : vector<8xf32>
    %31 = vector.multi_reduction <add>, %30, %cst_21 [1] : vector<8x20xf32> to vector<8xf32>
    %32 = vector.shape_cast %31 : vector<8xf32> to vector<8x1xf32>
    %cst_22 = arith.constant -5.000000e-01 : f32
    %33 = vector.broadcast %cst_22 : f32 to vector<8x1xf32>
    %34 = arith.mulf %33, %32 : vector<8x1xf32>
    %35 = tpu.iota {dimensions = array<i32: 1>} : vector<8x128xi32>
    %c4_i32 = arith.constant 4 : i32
    %36 = vector.broadcast %c4_i32 : i32 to vector<8x128xi32>
    %37 = arith.cmpi slt, %35, %36 : vector<8x128xi32>
    %38 = math.tanh %21 : vector<8x128xf32>
    %cst_23 = arith.constant 0.000000e+00 : f32
    %39 = vector.broadcast %cst_23 : f32 to vector<8x128xf32>
    %40 = arith.select %37, %38, %39 : vector<8x128xi1>, vector<8x128xf32>
    %41 = arith.addf %40, %23 : vector<8x128xf32>
    %42 = arith.truncf %41 : vector<8x128xf32> to vector<8x128xbf16>
    %c0_24 = arith.constant 0 : index
    %c0_25 = arith.constant 0 : index
    %43 = vector.load %arg9[%c0_24, %c0_25] : memref<8x128xbf16, #tpu.memory_space<vmem>>, vector<8x128xbf16>
    tpu.vector_store %arg9[%c0_24, %c0_25], %42 {strides = array<i32>} : memref<8x128xbf16, #tpu.memory_space<vmem>>, vector<8x128xbf16>,
    %c4_i32_26 = arith.constant 4 : i32
    %44 = vector.broadcast %c4_i32_26 : i32 to vector<8x128xi32>
    %45 = arith.cmpi eq, %35, %44 : vector<8x128xi32>
    %cst_27 = arith.constant 0.000000e+00 : f32
    %46 = vector.broadcast %cst_27 : f32 to vector<8x128xf32>
    %47 = arith.select %45, %21, %46 : vector<8x128xi1>, vector<8x128xf32>
    %cst_28 = arith.constant dense<0.000000e+00> : vector<8xf32>
    %48 = vector.multi_reduction <add>, %47, %cst_28 [1] : vector<8x128xf32> to vector<8xf32>
    %49 = vector.shape_cast %48 : vector<8xf32> to vector<8x1xf32>
    %c5_i32 = arith.constant 5 : i32
    %50 = vector.broadcast %c5_i32 : i32 to vector<8x128xi32>
    %51 = arith.cmpi eq, %35, %50 : vector<8x128xi32>
    %cst_29 = arith.constant 0.000000e+00 : f32
    %52 = vector.broadcast %cst_29 : f32 to vector<8x128xf32>
    %53 = arith.select %51, %21, %52 : vector<8x128xi1>, vector<8x128xf32>
    %cst_30 = arith.constant dense<0.000000e+00> : vector<8xf32>
    %54 = vector.multi_reduction <add>, %53, %cst_30 [1] : vector<8x128xf32> to vector<8xf32>
    %55 = vector.shape_cast %54 : vector<8xf32> to vector<8x1xf32>
    %56 = arith.addf %55, %34 : vector<8x1xf32>
    %57 = tpu.iota {dimensions = array<i32: 1>} : vector<8x8xi32>
    %c0_i32 = arith.constant 0 : i32
    %58 = vector.broadcast %c0_i32 : i32 to vector<8x8xi32>
    %59 = arith.cmpi eq, %57, %58 : vector<8x8xi32>
    %c1_i32 = arith.constant 1 : i32
    %60 = vector.broadcast %c1_i32 : i32 to vector<8x8xi32>
    %61 = arith.cmpi eq, %57, %60 : vector<8x8xi32>
    %cst_31 = arith.constant 0.000000e+00 : f32
    %62 = vector.shape_cast %56 : vector<8x1xf32> to vector<8x1xf32>
    %63 = vector.broadcast %62 : vector<8x1xf32> to vector<8x8xf32>
    %64 = vector.broadcast %cst_31 : f32 to vector<8x8xf32>
    %65 = arith.select %61, %63, %64 : vector<8x8xi1>, vector<8x8xf32>
    %66 = vector.shape_cast %49 : vector<8x1xf32> to vector<8x1xf32>
    %67 = vector.broadcast %66 : vector<8x1xf32> to vector<8x8xf32>
    %68 = arith.select %59, %67, %65 : vector<8x8xi1>, vector<8x8xf32>
    %c0_32 = arith.constant 0 : index
    %c0_33 = arith.constant 0 : index
    %69 = vector.load %arg10[%c0_32, %c0_33] : memref<8x8xf32, #tpu.memory_space<vmem>>, vector<8x8xf32>
    tpu.vector_store %arg10[%c0_32, %c0_33], %68 {strides = array<i32>} : memref<8x8xf32, #tpu.memory_space<vmem>>, vector<8x8xf32>,
    return
  }
  func.func @transform_0(%arg0: i32) -> (i32, i32) {
    %c0_i32 = arith.constant 0 : i32
    %c0_i32_0 = arith.constant 0 : i32
    return %arg0, %c0_i32 : i32, i32
  }
  func.func @transform_1(%arg0: i32) -> (i32, i32) {
    %c0_i32 = arith.constant 0 : i32
    %c0_i32_0 = arith.constant 0 : i32
    %c0_i32_1 = arith.constant 0 : i32
    return %c0_i32, %c0_i32_0 : i32, i32
  }
  func.func @transform_2(%arg0: i32) -> (i32, i32) {
    %c0_i32 = arith.constant 0 : i32
    %c0_i32_0 = arith.constant 0 : i32
    %c0_i32_1 = arith.constant 0 : i32
    return %c0_i32, %c0_i32_0 : i32, i32
  }
  func.func @transform_3(%arg0: i32) -> (i32, i32) {
    %c0_i32 = arith.constant 0 : i32
    %c0_i32_0 = arith.constant 0 : i32
    %c0_i32_1 = arith.constant 0 : i32
    return %c0_i32, %c0_i32_0 : i32, i32
  }
  func.func @transform_4(%arg0: i32) -> (i32, i32) {
    %c0_i32 = arith.constant 0 : i32
    %c0_i32_0 = arith.constant 0 : i32
    %c0_i32_1 = arith.constant 0 : i32
    return %c0_i32, %c0_i32_0 : i32, i32
  }
  func.func @transform_5(%arg0: i32) -> (i32, i32) {
    %c0_i32 = arith.constant 0 : i32
    %c0_i32_0 = arith.constant 0 : i32
    %c0_i32_1 = arith.constant 0 : i32
    return %c0_i32, %c0_i32_0 : i32, i32
  }
  func.func @transform_6(%arg0: i32) -> (i32, i32) {
    %c0_i32 = arith.constant 0 : i32
    %c0_i32_0 = arith.constant 0 : i32
    %c0_i32_1 = arith.constant 0 : i32
    return %c0_i32, %c0_i32_0 : i32, i32
  }
  func.func @transform_7(%arg0: i32) -> (i32, i32) {
    %c0_i32 = arith.constant 0 : i32
    %c0_i32_0 = arith.constant 0 : i32
    %c0_i32_1 = arith.constant 0 : i32
    return %c0_i32, %c0_i32_0 : i32, i32
  }
  func.func @transform_8(%arg0: i32) -> (i32, i32) {
    %c0_i32 = arith.constant 0 : i32
    %c0_i32_0 = arith.constant 0 : i32
    return %arg0, %c0_i32 : i32, i32
  }
  func.func @transform_9(%arg0: i32) -> (i32, i32) {
    %c0_i32 = arith.constant 0 : i32
    %c0_i32_0 = arith.constant 0 : i32
    return %arg0, %c0_i32 : i32, i32
  }
}

</mosaic_0001>

<bundles_post_ra>
// kernel: tpu_custom_call.1
= control target key start
LH: loop header
LB: loop body
LE: loop exit
PB: predicated region body
PF: predicated region fallthrough
CT: control target
= control target key end

     0   :  { %15 = vsyncpa [#allocation3], 0  ;;  %vm55_vm0 = vcmask 1041408   ;;  %s556_s0 = inlined_call_operand.vmem [shape: bf16[8,20], index: 0, kind: input, shape index: {}]   ;;  %s557_s1 = inlined_call_operand.vmem [shape: bf16[20,128], index: 1, kind: input, shape index: {}]   ;;  %s558_s2 = inlined_call_operand.vmem [shape: bf16[20,128], index: 2, kind: input, shape index: {}]   ;;  %s559_s3 = inlined_call_operand.vmem [shape: f32[1,128], index: 3, kind: input, shape index: {}]   ;;  %s560_s4 = inlined_call_operand.vmem [shape: bf16[128,64], index: 4, kind: input, shape index: {}]   ;;  %s561_s5 = inlined_call_operand.vmem [shape: f32[1,64], index: 5, kind: input, shape index: {}]   ;;  %s562_s6 = inlined_call_operand.vmem [shape: bf16[64,128], index: 6, kind: input, shape index: {}]   ;;  %s563_s7 = inlined_call_operand.vmem [shape: f32[1,128], index: 7, kind: input, shape index: {}]   ;;  %s564_s8 = inlined_call_operand.hbm [shape: bf16[8,128], index: 8, kind: output, shape index: {0}]   ;;  %s565_s9 = inlined_call_operand.hbm [shape: f32[8,8], index: 9, kind: output, shape index: {1}]  }
   0x1   :  { %v37_v0 = vld [vmem:[%s558_s2 + $0x8] sm:$0x3]  ;;  %v368_v2 = vld [vmem:[%s560_s4 + $0x38] sm:$0xff]  ;;  %v367_v4 = vld [vmem:[%s560_s4 + $0x30] sm:$0xff] }
   0x2   :  { %v47_v1 = vunpack.c.l.b16 %v37_v0  ;;  %142 = vmatpush.bf16.msra.mxu1 %v368_v2 }
   0x4   :  { %v49_v3 = vpack.c.b16 %v47_v1, %v47_v1 }
   0x5   :  { %16 = vsyncpa [#allocation5], 0  ;;  %v360_v6 = vld [vmem:[%s558_s2] sm:$0xff]  ;;  %v366_v7 = vld [vmem:[%s560_s4 + $0x28] sm:$0xff]  ;;  %vm51_vm1 = vcmask 162816   ;;  %v239_v28 = vlaneseq  ;;  %vm193_vm3 = vcmask 523264  }
   0x6   :  { %v57_v5 = vsel %vm55_vm0, %v49_v3, 0  ;;  %143 = vmatpush.bf16.msra.mxu1 %v367_v4  ;;  %v34_v8 = vld [vmem:[%s556_s0] sm:$0xf]  ;;  %v364_v10 = vld [vmem:[%s560_s4 + $0x18] sm:$0xff]  ;;  %v363_v11 = vld [vmem:[%s560_s4 + $0x10] sm:$0xff]  ;;  %s276_s24 = sshll.u32 %s564_s8, 4  ;;  %s277_s24 = int_to_ptr.hbm [resolvable:$true] %s276_s24 }
   0x7   :  { %65 = vmatpush.bf16.msra.mxu0 %v57_v5  ;;  %v365_v9 = vld [vmem:[%s560_s4 + $0x20] sm:$0xff]  ;;  %v362_v12 = vld [vmem:[%s560_s4 + $0x8] sm:$0xff]  ;;  %v372_v14 = vld [vmem:[%s562_s6 + $0x18] sm:$0xff]  ;;  %v238_v27 = vunpack.c.l.bf16 %v34_v8  ;;  %v240_v31 = vand.u32 127, %v239_v28  ;;  %s287_s27 = sshll.u32 %s565_s9, 4  ;;  %vm267_vm9 = vcmask 64512   ;;  %s288_s27 = int_to_ptr.hbm [resolvable:$true] %s287_s27 }
   0x8   :  { %v361_v13 = vld [vmem:[%s560_s4] sm:$0xff]  ;;  %201 = vmatpush.bf16.msra.mxu2 %v372_v14  ;;  %v371_v15 = vld [vmem:[%s562_s6 + $0x10] sm:$0xff]  ;;  %v370_v22 = vld [vmem:[%s562_s6 + $0x8] sm:$0xff] }
   0x9   :  { %v376_v16 = vld [vmem:[%s559_s3] ss:$0 sm:$0xff]  ;;  %v212_v24 = vld [vmem:[%s557_s1 + $0x8] sm:$0x3]  ;;  %v242_v32 = vmul.f32 %v238_v27, %v238_v27  ;;  %vm241_vm2 = vcmp.ge.s32.totalorder %v240_v31, 16  ;;  %vm258_vm4 = vcmp.eq.s32.totalorder %v240_v31, 5 }
   0xa   :  { %144 = vmatpush.bf16.msra.mxu1 %v366_v7  ;;  %v369_v23 = vld [vmem:[%s562_s6] sm:$0xff]  ;;  %v218_v25 = vunpack.c.l.b16 %v212_v24  ;;  %vm254_vm5 = vcmp.eq.s32.totalorder %v240_v31, 4  ;;  %vm248_vm6 = vcmp.lt.s32.totalorder %v240_v31, 4  ;;  %vm264_vm7 = vcmp.eq.s32.totalorder %v240_v31, 1 }
   0xb   :  { %66 = vmatpush.bf16.msra.mxu0 %v360_v6  ;;  %v373_v30 = vld [vmem:[%s557_s1] sm:$0xff]  ;;  %v243_v33 = vsel %vm241_vm2, %v242_v32, 0.0  ;;  %vm263_vm8 = vcmp.eq.s32.totalorder %v240_v31, 0 }
   0xc   :  { %202 = vmatpush.bf16.msra.mxu2 %v371_v15  ;;  %v220_v26 = vpack.c.b16 %v218_v25, %v218_v25  ;;  %v244_v34 = vsel %vm51_vm1, %v243_v33, 0.0  ;;  %v377_v35 = vld [vmem:[%s561_s5] ss:$0 sm:$0xff]  ;;  %s433_s5 = smov [#allocation2]  }
   0xd   :  { %245 = vadd.xlane.f32.xlu0 %v244_v34  ;;  %v378_v43 = vld [vmem:[%s563_s7] ss:$0 sm:$0xff]  ;;  %s274_s22 = sshll.u32 %s433_s5, 4  ;;  %s434_s7 = smov [#allocation4]   ;;  %s275_s22 = int_to_ptr.vmem [resolvable:$true] %s274_s22 }
   0xe   :  { %305 = vmatmul.msk.bf16.vlgmr.msra.gmra.mxu0 %vm51_vm1, %v34_v8  ;;  %145 = vmatpush.bf16.msra.mxu1 %v365_v9  ;;  %v223_v29 = vsel %vm55_vm0, %v220_v26, 0  ;;  %s285_s25 = sshll.u32 %s434_s7, 4  ;;  %s286_s25 = int_to_ptr.vmem [resolvable:$true] %s285_s25 }
   0xf   :  { %231 = vmatpush.bf16.msra.mxu3 %v223_v29 }
  0x10   :  { %203 = vmatpush.bf16.msra.mxu2 %v370_v22 }
  0x12   :  { %146 = vmatpush.bf16.msra.mxu1 %v364_v10 }
  0x13   :  { %232 = vmatpush.bf16.msra.mxu3 %v373_v30 }
  0x14   :  { %204 = vmatpush.bf16.msra.mxu2 %v369_v23 }
  0x16   :  { %147 = vmatpush.bf16.msra.mxu1 %v363_v11  ;;  %359 = vmatmul.msk.bf16.vlgmr.msra.gmra.mxu3 %vm51_vm1, %v34_v8 }
  0x1a   :  { %148 = vmatpush.bf16.msra.mxu1 %v362_v12 }
  0x1e   :  { %149 = vmatpush.bf16.msra.mxu1 %v361_v13 }
  0x80   :  { %v246_v53 = vpop.xlane.xlu0 %245 }
  0x81   :  { %v247_v54 = vmul.f32 -0.5, %v246_v53 }
  0x8b   :  { %v68_v17 = vpop.f32.mrf.mxu0 }
  0x8c   :  { %v69_v18 = vadd.f32 %v376_v16, %v68_v17 }
  0x8e   :  { %v72_v19 = vmax.f32 %v69_v18, 0.0 }
  0x90   :  { %v73_v20 = vpack.c.bf16 %v72_v19, %v72_v19 }
  0x92   :  { %150 = vmatmul.bf16.vlgmr.msra.gmra.mxu1 %v73_v20 }
  0x93   :  { %v70_v21 = vpop.f32.mrf.mxu0 }
  0x99   :  { %v234_v41 = vpop.f32.mrf.mxu3 }
  0xa1   :  { %v236_v42 = vpop.f32.mrf.mxu3 }
 0x10f   :  { %v151_v36 = vpop.f32.mrf.mxu1 }
 0x110   :  { %v152_v37 = vadd.f32 %v377_v35, %v151_v36 }
 0x112   :  { %v155_v38 = vmax.f32 %v152_v37, 0.0 }
 0x114   :  { %v156_v39 = vpack.c.bf16 %v155_v38, %v155_v38 }
 0x116   :  { %354 = vmatmul.msk.bf16.vlgmr.msra.gmra.mxu2 %vm193_vm3, %v156_v39 }
 0x117   :  { %v153_v40 = vpop.f32.mrf.mxu1 }
 0x199   :  { %v206_v44 = vpop.f32.mrf.mxu2 }
 0x19a   :  { %v207_v45 = vadd.f32 %v378_v43, %v206_v44 }
 0x19c   :  { %379 = vtanh.f32 %v207_v45  ;;  %v259_v46 = vsel %vm258_vm4, %v207_v45, 0.0  ;;  %v255_v47 = vsel %vm254_vm5, %v207_v45, 0.0 }
 0x19d   :  { %260 = vadd.xlane.f32.xlu0 %v259_v46  ;;  %256 = vadd.xlane.f32.xlu1 %v255_v47 }
 0x1a1   :  { %v208_v48 = vpop.f32.mrf.mxu2 }
 0x1a2   :  { %v380_v49 = vpop.eup %379 }
 0x1a3   :  { %v250_v50 = vsel %vm248_vm6, %v380_v49, 0.0 }
 0x1a4   :  { %v251_v51 = vadd.f32 %v250_v50, %v234_v41 }
 0x1a6   :  { %v252_v52 = vpack.c.bf16 %v251_v51, %v251_v51 }
 0x1a8   :  { %253 = vst [vmem:[#allocation2] sm:$0xf] %v252_v52 }
 0x1a9   :  { %279 = dma.vmem_to_hbm [thread:$0]  %s275_s22, 64, %s277_s24, [#allocation3]  }
 0x210   :  { %v261_v55 = vpop.xlane.xlu0 %260  ;;  %v257_v58 = vpop.xlane.xlu1 %256 }
 0x211   :  { %v262_v56 = vadd.f32 %v261_v55, %v247_v54 }
 0x213   :  { %v265_v57 = vsel %vm264_vm7, %v262_v56, 0.0 }
 0x214   :  { %v266_v59 = vsel %vm263_vm8, %v257_v58, %v265_v57 }
 0x215   :  { %268 = vst.msk [vmem:[#allocation4] sm:$0xff] %vm267_vm9, %v266_v59 }
 0x216   :  { %290 = dma.vmem_to_hbm [thread:$0]  %s286_s25, 128, %s288_s27, [#allocation5]  }
 0x217   :  { %429 = dma.done.wait [#allocation3], 64  }
 0x218   :  { %430 = vsyncadd [#allocation3], 4294967232 }
 0x219   :  { %431 = dma.done.wait [#allocation5], 128  }
 0x21a   :  { %432 = vsyncadd [#allocation5], 4294967168 }
 0x21b   :  { %299 = vsyncpa [#allocation3], 1 }
 0x21c   :  { %300 = vsyncpa [#allocation5], 1 }

</bundles_post_ra>
